<compile_context>
chip_gen: v6e
topology: v6e:2x2x1
jax: 0.10.0
libtpu: 0.0.40
codegen_flags: <defaults>
</compile_context>

<pallas_src>
import jax
import jax.numpy as jnp
from jax import lax
from jax.experimental import pallas as pl
from jax.experimental.pallas import tpu as pltpu


def mlp_kernel(x_ref, w1_ref, b1_ref, w2_ref, b2_ref, o_ref):
    # x_ref: (B, 2) f32 in VMEM; weights/biases are SMEM scalars.
    x = x_ref[...]                       # (B, 2)
    x0 = x[:, 0:1]                       # (B, 1)
    x1 = x[:, 1:2]                       # (B, 1)

    b1 = b1_ref[0]                       # PyTorch bias has shape (1,) -> broadcasts
    # Layer 1: h_j = sigmoid(x0 * W1[j,0] + x1 * W1[j,1] + b1)   (VPU + EUP)
    h0 = jax.nn.sigmoid(x0 * w1_ref[0, 0] + x1 * w1_ref[0, 1] + b1)
    h1 = jax.nn.sigmoid(x0 * w1_ref[1, 0] + x1 * w1_ref[1, 1] + b1)

    b2 = b2_ref[0]
    # Layer 2: y_j = sigmoid(h0 * W2[j,0] + h1 * W2[j,1] + b2)
    y0 = jax.nn.sigmoid(h0 * w2_ref[0, 0] + h1 * w2_ref[0, 1] + b2)
    y1 = jax.nn.sigmoid(h0 * w2_ref[1, 0] + h1 * w2_ref[1, 1] + b2)

    o_ref[...] = jnp.concatenate([y0, y1], axis=1)   # (B, 2)


def net_forward(x, w1, b1, w2, b2):
    """x: (B, 2) float32.  Returns (B, 2) float32, matching PyTorch Net.forward."""
    x = x.astype(jnp.float32)
    B, d_in = x.shape
    d_out = w2.shape[0]
    assert d_in == 2 and w1.shape == (2, 2) and w2.shape == (2, 2)

    w1 = w1.astype(jnp.float32)
    w2 = w2.astype(jnp.float32)
    b1 = jnp.asarray(b1, jnp.float32).reshape((1,))
    b2 = jnp.asarray(b2, jnp.float32).reshape((1,))

    # Tiny advisory cost: ~8 MACs + 4 sigmoids per row, a few hundred bytes total.
    cost = pl.CostEstimate(
        flops=16 * B,
        transcendentals=4 * B,
        bytes_accessed=(2 * B * d_in + 2 * B * d_out) * 4 + (4 + 4 + 1 + 1) * 4,
    )

    out = pl.pallas_call(
        mlp_kernel,
        out_shape=jax.ShapeDtypeStruct((B, d_out), jnp.float32),
        in_specs=[
            pl.BlockSpec(memory_space=pltpu.MemorySpace.VMEM),   # x (full array)
            pl.BlockSpec(memory_space=pltpu.MemorySpace.SMEM),   # w1 (2,2) scalars
            pl.BlockSpec(memory_space=pltpu.MemorySpace.SMEM),   # b1 (1,)
            pl.BlockSpec(memory_space=pltpu.MemorySpace.SMEM),   # w2 (2,2) scalars
            pl.BlockSpec(memory_space=pltpu.MemorySpace.SMEM),   # b2 (1,)
        ],
        out_specs=pl.BlockSpec(memory_space=pltpu.MemorySpace.VMEM),
        cost_estimate=cost,
    )(x, w1, b1, w2, b2)

    return out


def net_forward_ref(x, w1, b1, w2, b2):
    h = jax.nn.sigmoid(
        jnp.dot(x, w1.T, precision=lax.Precision.HIGHEST) + b1)
    return jax.nn.sigmoid(
        jnp.dot(h, w2.T, precision=lax.Precision.HIGHEST) + b2)


if __name__ == "__main__":
    # Deterministic parameters, exactly as in Net.__init__
    w1 = jnp.array([[0.15, 0.20], [0.25, 0.30]], dtype=jnp.float32)
    b1 = jnp.array([0.35], dtype=jnp.float32)
    w2 = jnp.array([[0.40, 0.45], [0.50, 0.55]], dtype=jnp.float32)
    b2 = jnp.array([0.60], dtype=jnp.float32)

    # Small deterministic input: batch=2, features=2 (matches nn.Linear(2, 2))
    key = jax.random.PRNGKey(0)
    x = jax.random.uniform(key, (2, 2), dtype=jnp.float32)

    out = net_forward(x, w1, b1, w2, b2)
    out = jax.block_until_ready(out)

    ref = net_forward_ref(x, w1, b1, w2, b2)
    assert out.shape == (2, 2)
    assert jnp.allclose(out, ref, atol=1e-5, rtol=1e-5), (out, ref)

    print("KERNEL_OK")
</pallas_src>

<mosaic_0001>
module attributes {stable_mosaic.version = 11 : i64} {
  func.func @mlp_kernel(%arg0: memref<2x2xf32, #tpu.memory_space<vmem>>, %arg1: memref<2x2xf32, #tpu.memory_space<smem>>, %arg2: memref<1xf32, #tpu.memory_space<smem>>, %arg3: memref<2x2xf32, #tpu.memory_space<smem>>, %arg4: memref<1xf32, #tpu.memory_space<smem>>, %arg5: memref<2x2xf32, #tpu.memory_space<vmem>>) attributes {dimension_semantics = [], scalar_prefetch = 0 : i64, scratch_operands = 0 : i64, tpu.core_type = #tpu.core_type<tc>} {
    %c0 = arith.constant 0 : index
    %c0_0 = arith.constant 0 : index
    %0 = vector.load %arg0[%c0, %c0_0] : memref<2x2xf32, #tpu.memory_space<vmem>>, vector<2x2xf32>
    %1 = vector.extract_strided_slice %0 {offsets = [0, 0], sizes = [2, 1], strides = [1, 1]} : vector<2x2xf32> to vector<2x1xf32>
    %2 = vector.extract_strided_slice %0 {offsets = [0, 1], sizes = [2, 1], strides = [1, 1]} : vector<2x2xf32> to vector<2x1xf32>
    %c0_1 = arith.constant 0 : index
    %3 = memref.load %arg2[%c0_1] : memref<1xf32, #tpu.memory_space<smem>>
    %c0_2 = arith.constant 0 : index
    %c0_3 = arith.constant 0 : index
    %4 = memref.load %arg1[%c0_2, %c0_3] : memref<2x2xf32, #tpu.memory_space<smem>>
    %5 = vector.broadcast %4 : f32 to vector<2x1xf32>
    %6 = arith.mulf %1, %5 : vector<2x1xf32>
    %c0_4 = arith.constant 0 : index
    %c1 = arith.constant 1 : index
    %7 = memref.load %arg1[%c0_4, %c1] : memref<2x2xf32, #tpu.memory_space<smem>>
    %8 = vector.broadcast %7 : f32 to vector<2x1xf32>
    %9 = arith.mulf %2, %8 : vector<2x1xf32>
    %10 = arith.addf %6, %9 : vector<2x1xf32>
    %11 = vector.broadcast %3 : f32 to vector<2x1xf32>
    %12 = arith.addf %10, %11 : vector<2x1xf32>
    %13 = arith.negf %12 : vector<2x1xf32>
    %14 = math.exp %13 : vector<2x1xf32>
    %cst = arith.constant 1.000000e+00 : f32
    %15 = vector.broadcast %cst : f32 to vector<2x1xf32>
    %16 = arith.addf %15, %14 : vector<2x1xf32>
    %17 = arith.divf %15, %16 : vector<2x1xf32>
    %c1_5 = arith.constant 1 : index
    %c0_6 = arith.constant 0 : index
    %18 = memref.load %arg1[%c1_5, %c0_6] : memref<2x2xf32, #tpu.memory_space<smem>>
    %19 = vector.broadcast %18 : f32 to vector<2x1xf32>
    %20 = arith.mulf %1, %19 : vector<2x1xf32>
    %c1_7 = arith.constant 1 : index
    %c1_8 = arith.constant 1 : index
    %21 = memref.load %arg1[%c1_7, %c1_8] : memref<2x2xf32, #tpu.memory_space<smem>>
    %22 = vector.broadcast %21 : f32 to vector<2x1xf32>
    %23 = arith.mulf %2, %22 : vector<2x1xf32>
    %24 = arith.addf %20, %23 : vector<2x1xf32>
    %25 = vector.broadcast %3 : f32 to vector<2x1xf32>
    %26 = arith.addf %24, %25 : vector<2x1xf32>
    %27 = arith.negf %26 : vector<2x1xf32>
    %28 = math.exp %27 : vector<2x1xf32>
    %cst_9 = arith.constant 1.000000e+00 : f32
    %29 = vector.broadcast %cst_9 : f32 to vector<2x1xf32>
    %30 = arith.addf %29, %28 : vector<2x1xf32>
    %31 = arith.divf %29, %30 : vector<2x1xf32>
    %c0_10 = arith.constant 0 : index
    %32 = memref.load %arg4[%c0_10] : memref<1xf32, #tpu.memory_space<smem>>
    %c0_11 = arith.constant 0 : index
    %c0_12 = arith.constant 0 : index
    %33 = memref.load %arg3[%c0_11, %c0_12] : memref<2x2xf32, #tpu.memory_space<smem>>
    %34 = vector.broadcast %33 : f32 to vector<2x1xf32>
    %35 = arith.mulf %17, %34 : vector<2x1xf32>
    %c0_13 = arith.constant 0 : index
    %c1_14 = arith.constant 1 : index
    %36 = memref.load %arg3[%c0_13, %c1_14] : memref<2x2xf32, #tpu.memory_space<smem>>
    %37 = vector.broadcast %36 : f32 to vector<2x1xf32>
    %38 = arith.mulf %31, %37 : vector<2x1xf32>
    %39 = arith.addf %35, %38 : vector<2x1xf32>
    %40 = vector.broadcast %32 : f32 to vector<2x1xf32>
    %41 = arith.addf %39, %40 : vector<2x1xf32>
    %42 = arith.negf %41 : vector<2x1xf32>
    %43 = math.exp %42 : vector<2x1xf32>
    %cst_15 = arith.constant 1.000000e+00 : f32
    %44 = vector.broadcast %cst_15 : f32 to vector<2x1xf32>
    %45 = arith.addf %44, %43 : vector<2x1xf32>
    %46 = arith.divf %44, %45 : vector<2x1xf32>
    %c1_16 = arith.constant 1 : index
    %c0_17 = arith.constant 0 : index
    %47 = memref.load %arg3[%c1_16, %c0_17] : memref<2x2xf32, #tpu.memory_space<smem>>
    %48 = vector.broadcast %47 : f32 to vector<2x1xf32>
    %49 = arith.mulf %17, %48 : vector<2x1xf32>
    %c1_18 = arith.constant 1 : index
    %c1_19 = arith.constant 1 : index
    %50 = memref.load %arg3[%c1_18, %c1_19] : memref<2x2xf32, #tpu.memory_space<smem>>
    %51 = vector.broadcast %50 : f32 to vector<2x1xf32>
    %52 = arith.mulf %31, %51 : vector<2x1xf32>
    %53 = arith.addf %49, %52 : vector<2x1xf32>
    %54 = vector.broadcast %32 : f32 to vector<2x1xf32>
    %55 = arith.addf %53, %54 : vector<2x1xf32>
    %56 = arith.negf %55 : vector<2x1xf32>
    %57 = math.exp %56 : vector<2x1xf32>
    %cst_20 = arith.constant 1.000000e+00 : f32
    %58 = vector.broadcast %cst_20 : f32 to vector<2x1xf32>
    %59 = arith.addf %58, %57 : vector<2x1xf32>
    %60 = arith.divf %58, %59 : vector<2x1xf32>
    %61 = tpu.concatenate %46, %60 in 1 : vector<2x1xf32>, vector<2x1xf32> -> vector<2x2xf32>
    %c0_21 = arith.constant 0 : index
    %c0_22 = arith.constant 0 : index
    %62 = vector.load %arg5[%c0_21, %c0_22] : memref<2x2xf32, #tpu.memory_space<vmem>>, vector<2x2xf32>
    tpu.vector_store %arg5[%c0_21, %c0_22], %61 {strides = array<i32>} : memref<2x2xf32, #tpu.memory_space<vmem>>, vector<2x2xf32>,
    return
  }
}

</mosaic_0001>

<bundles_post_ra>
// kernel: tpu_custom_call.1
= control target key start
LH: loop header
LB: loop body
LE: loop exit
PB: predicated region body
PF: predicated region fallthrough
CT: control target
= control target key end

     0   :  { %12 = vsyncpa [#allocation6], 0  ;;  %s275_s0 = inlined_call_operand.vmem [shape: f32[2,2], index: 0, kind: input, shape index: {}]   ;;  %s276_s1 = inlined_call_operand.vmem [shape: f32[2,2], index: 1, kind: input, shape index: {}]   ;;  %s277_s2 = inlined_call_operand.<no memory space> [shape: f32[1], index: 2, kind: input, shape index: {}]   ;;  %s278_s3 = inlined_call_operand.vmem [shape: f32[2,2], index: 3, kind: input, shape index: {}]   ;;  %s279_s4 = inlined_call_operand.<no memory space> [shape: f32[1], index: 4, kind: input, shape index: {}]   ;;  %s280_s5 = inlined_call_operand.hbm [shape: f32[2,2], index: 5, kind: output, shape index: {}]  }
   0x1   :  { %13 = vsyncpa [#allocation8], 0 }
   0x2   :  { %14 = vsyncpa [#allocation5], 0  ;;  %s23_s20 = sshll.u32 %s276_s1, 4  ;;  %s35_s23 = sshll.u32 %s278_s3, 4  ;;  %s24_s20 = int_to_ptr.vmem [resolvable:$true] %s23_s20  ;;  %s36_s23 = int_to_ptr.vmem [resolvable:$true] %s35_s23 }
   0x3   :  { %s172_s24 = scalar_lea.vmem %s24_s20, 32  ;;  %p177_p1 = scmp.lt.s32.totalorder %s24_s20, %s24_s20 }
   0x4   :  { %p173_p0 = scmp.ne.s32.totalorder %s24_s20, %s172_s24  ;;  %p178_p2 = scmp.lt.s32.totalorder %s172_s24, %s172_s24 }
   0x6   :  { %p179_p3 = por %p178_p2, %p177_p1 }
   0x8   :  { %p180_p4 = pnand %p179_p3, %p173_p0 }
   0xa   :  { %183 = shalt.err (!%p180_p4)
}
   0xb   :  { %s222_s25 = smov [#allocation4]   ;;  %s184_s26 = scalar_lea.vmem %s36_s23, 32 }
   0xc   :  { %26 = dma.vmem_to_smem %s24_s20, 32, %s222_s25, [#allocation6]  }
   0xd   :  { %p185_p5 = scmp.ne.s32.totalorder %s36_s23, %s184_s26  ;;  %p189_p6 = scmp.lt.s32.totalorder %s36_s23, %s36_s23 }
   0xe   :  { %p190_p7 = scmp.lt.s32.totalorder %s184_s26, %s184_s26 }
  0x10   :  { %p191_p8 = por %p190_p7, %p189_p6 }
  0x12   :  { %p192_p9 = pnand %p191_p8, %p185_p5 }
  0x14   :  { %195 = shalt.err (!%p192_p9)
}
  0x15   :  { %s223_s1 = smov [#allocation7]  }
  0x16   :  { %38 = dma.vmem_to_smem %s36_s23, 32, %s223_s1, [#allocation8]  }
  0x17   :  { %216 = dma.done.wait [#allocation6], 32  }
  0x18   :  { %217 = vsyncadd [#allocation6], 4294967264 }
  0x19   :  { %218 = dma.done.wait [#allocation8], 32  }
  0x1a   :  { %219 = vsyncadd [#allocation8], 4294967264 }
  0x1b   :  { %47 = sfence }
  0x1c   :  { %s141_s3 = sld [smem:[#allocation4 + $0x1]]  ;;  %v48_v0 = vld [vmem:[%s275_s0] sm:$0x3]  ;;  %s224_s30 = smov 127   ;;  %v61_v8 = vstv %s277_s2  ;;  %v95_v32 = vstv %s279_s4  ;;  %vm121_vm0 = vcmask 7168   ;;  %vm123_vm1 = vcmask 9216  }
  0x1d   :  { %s144_s27 = sld [smem:[#allocation4 + $0x81]]  ;;  %s225_s14 = smov 1  }
  0x1e   :  { %s50_s6 = sld [smem:[#allocation4]]  ;;  %s226_s15 = smov [#allocation9]  }
  0x1f   :  { %s143_s7 = sld [smem:[#allocation4 + $0x80]]  ;;  %s131_s16 = sshll.u32 %s226_s15, 4  ;;  %s132_s16 = int_to_ptr.vmem [resolvable:$true] %s131_s16 }
  0x20   :  { %s88_s0 = sld [smem:[#allocation7]]  ;;  %s196_s4 = scalar_lea.vmem %s132_s16, 32 }
  0x21   :  { %s148_s10 = sld [smem:[#allocation7 + $0x80]]  ;;  %p197_p10 = scmp.ne.s32.totalorder %s132_s16, %s196_s4 }
  0x22   :  { %v54_v1 = vstv %s141_s3  ;;  %s146_s2 = sld [smem:[#allocation7 + $0x1]]  ;;  %p201_p11 = scmp.lt.s32.totalorder %s132_s16, %s132_s16 }
  0x23   :  { %v55_v2 = vmul.f32 %v54_v1, %v48_v0  ;;  %v73_v3 = vstv %s144_s27  ;;  %s149_s11 = sld [smem:[#allocation7 + $0x81]]  ;;  %p202_p12 = scmp.lt.s32.totalorder %s196_s4, %s196_s4 }
  0x24   :  { %v74_v4 = vmul.f32 %v73_v3, %v48_v0  ;;  %v51_v5 = vstv %s50_s6 }
  0x25   :  { %57 = vrot.lane.b32.xlu0 %v55_v2, %s224_s30  ;;  %v52_v6 = vmul.f32 %v51_v5, %v48_v0  ;;  %v70_v7 = vstv %s143_s7  ;;  %p203_p13 = por %p202_p12, %p201_p11 }
  0x26   :  { %v71_v11 = vmul.f32 %v70_v7, %v48_v0  ;;  %v89_v23 = vstv %s88_s0 }
  0x27   :  { %v104_v24 = vstv %s148_s10  ;;  %p204_p0 = pnand %p203_p13, %p197_p10 }
  0x28   :  { %v92_v25 = vstv %s146_s2 }
  0x29   :  { %76 = vrot.lane.b32.xlu0 %v74_v4, %s224_s30  ;;  %v107_v26 = vstv %s149_s11 }
  0x97   :  { %v58_v9 = vpop.permute.xlu0 %57 }
  0x98   :  { %v60_v10 = vadd.f32 %v58_v9, %v52_v6 }
  0x9a   :  { %v62_v12 = vadd.f32 %v61_v8, %v60_v10 }
  0x9b   :  { %v77_v13 = vpop.permute.xlu0 %76 }
  0x9c   :  { %v142_v14 = vmul.f32 -1.442695, %v62_v12  ;;  %v79_v15 = vadd.f32 %v77_v13, %v71_v11 }
  0x9e   :  { %156 = vpow2.f32 %v142_v14  ;;  %v80_v16 = vadd.f32 %v79_v15, %v61_v8 }
  0xa0   :  { %v145_v17 = vmul.f32 -1.442695, %v80_v16 }
  0xa2   :  { %158 = vpow2.f32 %v145_v17 }
  0xab   :  { %v157_v18 = vpop.eup %156 }
  0xac   :  { %v66_v19 = vadd.f32 1.0, %v157_v18 }
  0xae   :  { %160 = vrcp.f32 %v66_v19 }
  0xaf   :  { %v159_v20 = vpop.eup %158 }
  0xb0   :  { %v84_v21 = vadd.f32 1.0, %v159_v20 }
  0xb2   :  { %162 = vrcp.f32 %v84_v21 }
  0xbb   :  { %v161_v22 = vpop.eup %160 }
  0xbc   :  { %v90_v28 = vmul.f32 %v161_v22, %v89_v23  ;;  %v105_v29 = vmul.f32 %v161_v22, %v104_v24 }
  0xbf   :  { %v163_v27 = vpop.eup %162 }
  0xc0   :  { %v93_v30 = vmul.f32 %v163_v27, %v92_v25  ;;  %v108_v31 = vmul.f32 %v163_v27, %v107_v26 }
  0xc2   :  { %v109_v33 = vadd.f32 %v108_v31, %v105_v29  ;;  %v94_v34 = vadd.f32 %v93_v30, %v90_v28 }
  0xc4   :  { %v110_v35 = vadd.f32 %v109_v33, %v95_v32  ;;  %v96_v36 = vadd.f32 %v95_v32, %v94_v34 }
  0xc6   :  { %v150_v37 = vmul.f32 -1.442695, %v110_v35  ;;  %v147_v41 = vmul.f32 -1.442695, %v96_v36 }
  0xc8   :  { %164 = vpow2.f32 %v150_v37 }
  0xd5   :  { %v165_v38 = vpop.eup %164 }
  0xd6   :  { %v114_v39 = vadd.f32 1.0, %v165_v38 }
  0xd8   :  { %166 = vrcp.f32 %v114_v39 }
  0xd9   :  { %168 = vpow2.f32 %v147_v41 }
  0xe5   :  { %v167_v40 = vpop.eup %166 }
  0xe6   :  { %118 = vrot.lane.b32.xlu1 %v167_v40, %s225_s14  ;;  %v169_v42 = vpop.eup %168 }
  0xe7   :  { %v100_v43 = vadd.f32 1.0, %v169_v42 }
  0xe9   :  { %170 = vrcp.f32 %v100_v43 }
  0xf6   :  { %v171_v44 = vpop.eup %170 }
 0x158   :  { %v119_v45 = vpop.permute.xlu1 %118 }
 0x159   :  { %v122_v46 = vsel %vm121_vm0, %v171_v44, %v119_v45 }
 0x15a   :  { %124 = vst.msk [vmem:[#allocation9] sm:$0x3] %vm123_vm1, %v122_v46 }
 0x15b   :  { %207 = shalt.err (!%p204_p0)
}
 0x15c   :  { %134 = dma.vmem_to_hbm [thread:$0]  %s132_s16, 32, %s280_s5, [#allocation5]  }
 0x15d   :  { %220 = dma.done.wait [#allocation5], 32  }
 0x15e   :  { %221 = vsyncadd [#allocation5], 4294967264 }
 0x15f   :  { %138 = vsyncpa [#allocation5], 1 }
 0x160   :  { %139 = vsyncpa [#allocation6], 1 }
 0x161   :  { %140 = vsyncpa [#allocation8], 1 }

</bundles_post_ra>
